<compile_context>
chip_gen: v7x
topology: tpu7x:2x2x1
jax: 0.10.0
libtpu: 0.0.40
codegen_flags: <defaults>
</compile_context>

<pallas_src>
import functools
import math

import jax
import jax.numpy as jnp
import numpy as np
from jax import lax
from jax.experimental import pallas as pl
from jax.experimental.pallas import tpu as pltpu

_MIB = 1024 * 1024


def _pick_tile(seq_len):
    """Largest convenient row/query tile: full sequence if small, else a divisor."""
    if seq_len <= 512:
        return seq_len
    for t in (512, 256, 128, 64, 32, 16, 8):
        if seq_len % t == 0:
            return t
    return seq_len


def _vmem_limit(est_bytes):
    """vmem_limit_bytes derived from physical VMEM capacity with headroom."""
    try:
        cap = int(pltpu.get_tpu_info().vmem_capacity_bytes)
    except Exception:  # interpret mode / older runtimes
        cap = 64 * _MIB  # conservative (v7x per-TensorCore capacity)
    return int(min(max(2 * est_bytes, 32 * _MIB), int(0.85 * cap)))


def _spec(shape, index_map, single_buffer):
    """BlockSpec; constant-index blocks request single buffering (saves VMEM)."""
    if single_buffer:
        return pl.BlockSpec(shape, index_map, pipeline_mode=pl.Buffered(1))
    return pl.BlockSpec(shape, index_map)


# --------------------------------------------------------------------------
# Tiled linear projection kernel: y = x @ W + b
# --------------------------------------------------------------------------
def _linear_kernel(x_ref, w_ref, b_ref, o_ref):
    y = jnp.dot(x_ref[0].astype(jnp.bfloat16), w_ref[...],
                preferred_element_type=jnp.float32)
    o_ref[0] = (y + b_ref[...]).astype(o_ref.dtype)


def _linear(x, w, b, *, out_dtype, row_block=None):
    """y[bi, s, :] = x[bi, s, :] @ w + b   (w: [D_in, D_out], b: [D_out])."""
    B, S, Din = x.shape
    Dout = w.shape[1]
    tr = row_block if row_block is not None else _pick_tile(S)
    assert S % tr == 0, "row tile must divide sequence length"
    nr = S // tr

    w_bf = w.astype(jnp.bfloat16)                 # bf16 MXU operand (cast once, XLA)
    b2 = b.reshape(1, Dout).astype(jnp.float32)   # fp32 bias, added to fp32 acc
    out_isize = np.dtype(out_dtype).itemsize

    est = (2 * tr * Din * x.dtype.itemsize        # x blocks (double buffered)
           + Din * Dout * 2 + Dout * 4            # weight + bias (single buffered)
           + 2 * tr * Dout * out_isize            # output blocks
           + 2 * tr * Dout * 4)                   # fp32 matmul temporaries
    flops = 2 * B * S * Din * Dout
    bytes_accessed = (B * S * Din * x.dtype.itemsize + Din * Dout * 2 + Dout * 4
                      + B * S * Dout * out_isize)
    const = lambda bi, ri: (0, 0)

    def run(single_buffer):
        grid_spec = pltpu.PrefetchScalarGridSpec(
            num_scalar_prefetch=0,
            grid=(B, nr),
            in_specs=[
                pl.BlockSpec((1, tr, Din), lambda bi, ri: (bi, ri, 0)),
                _spec((Din, Dout), const, single_buffer),
                _spec((1, Dout), const, single_buffer),
            ],
            out_specs=pl.BlockSpec((1, tr, Dout), lambda bi, ri: (bi, ri, 0)),
        )
        return pl.pallas_call(
            _linear_kernel,
            out_shape=jax.ShapeDtypeStruct((B, S, Dout), out_dtype),
            grid_spec=grid_spec,
            compiler_params=pltpu.CompilerParams(
                dimension_semantics=("parallel", "parallel"),
                vmem_limit_bytes=_vmem_limit(est),
            ),
            cost_estimate=pl.CostEstimate(flops=int(flops), transcendentals=0,
                                          bytes_accessed=int(bytes_accessed)),
        )(x, w_bf, b2)

    try:
        return run(True)
    except Exception:
        # Fallback for JAX builds that reject single-buffered (Buffered(1)) specs.
        return run(False)


# --------------------------------------------------------------------------
# Attention kernel: softmax(Q K^T) V per head + fused output projection.
# Q/K/V are already projected (bf16); Q already carries the 1/sqrt(hd) scale.
# --------------------------------------------------------------------------
def _mhsa_kernel(q_ref, k_ref, v_ref, wo_ref, bo_ref, o_ref, ctx_ref, *,
                 num_heads, head_dim):
    q = q_ref[0]          # (tq, D) bf16 (scale folded into the Q projection)
    k = k_ref[0]          # (Sk, D) bf16
    v = v_ref[0]          # (Sk, D) bf16

    # Contract last dim of both operands: qh @ kh^T without an explicit .T.
    dn = (((1,), (1,)), ((), ()))

    # TODO(synk): per-head (tq, hd) context stores are masked when hd < 128;
    # a head-batched layout / fori_loop is a follow-up for large H.
    for h in range(num_heads):
        sl = slice(h * head_dim, (h + 1) * head_dim)
        s = lax.dot_general(q[:, sl], k[:, sl], dn,
                            preferred_element_type=jnp.float32)   # (tq, Sk) f32
        m = jnp.max(s, axis=-1, keepdims=True)
        p = jnp.exp(s - m)                                        # f32 (EUP)
        denom = jnp.sum(p, axis=-1, keepdims=True)
        attn = p * pl.reciprocal(denom, approx=True)
        ctx_ref[:, sl] = jnp.dot(attn.astype(jnp.bfloat16), v[:, sl],
                                 preferred_element_type=jnp.float32)

    # Fused output projection on the lane-dense (tq, D) context; the only HBM
    # store is the full lane-dense (1, tq, D) output block.
    ctx = ctx_ref[...].astype(jnp.bfloat16)
    out = (jnp.dot(ctx, wo_ref[...], preferred_element_type=jnp.float32)
           + bo_ref[...])
    o_ref[0] = out.astype(o_ref.dtype)


def _attention(q_p, k_p, v_p, wo, bo, *, num_heads, out_dtype, q_block=None):
    B, Sq, D = q_p.shape
    _, Sk, _ = k_p.shape
    head_dim = D // num_heads
    tq = q_block if q_block is not None else _pick_tile(Sq)
    assert Sq % tq == 0, "query tile must divide q_len"
    nq = Sq // tq

    wo_bf = wo.astype(jnp.bfloat16)
    bo2 = bo.reshape(1, D).astype(jnp.float32)
    out_isize = np.dtype(out_dtype).itemsize
    const = lambda b, qi: (0, 0)

    est = (2 * tq * D * 2                 # q blocks (bf16, double buffered)
           + 2 * Sk * D * 2               # k + v blocks (bf16, single buffered)
           + D * D * 2 + D * 4            # wo (bf16) + bo (single buffered)
           + 2 * tq * D * out_isize       # output blocks
           + 3 * tq * Sk * 4              # score / prob fp32 temporaries
           + 2 * tq * D * 4)              # ctx scratch + fp32 out temporary
    flops = (2 * B * Sq * Sk * D * 2      # QK^T + attn @ V over all heads
             + 2 * B * Sq * D * D)        # fused output projection
    transcend = B * num_heads * Sq * Sk
    bytes_accessed = (B * Sq * D * 2 + 2 * B * Sk * D * 2
                      + D * D * 2 + D * 4 + B * Sq * D * out_isize)

    kernel = functools.partial(_mhsa_kernel, num_heads=num_heads,
                               head_dim=head_dim)

    def run(single_buffer):
        grid_spec = pltpu.PrefetchScalarGridSpec(
            num_scalar_prefetch=0,
            grid=(B, nq),
            in_specs=[
                pl.BlockSpec((1, tq, D), lambda b, qi: (b, qi, 0)),       # q tile
                _spec((1, Sk, D), lambda b, qi: (b, 0, 0), single_buffer),  # k
                _spec((1, Sk, D), lambda b, qi: (b, 0, 0), single_buffer),  # v
                _spec((D, D), const, single_buffer),                        # wo
                _spec((1, D), const, single_buffer),                        # bo
            ],
            out_specs=pl.BlockSpec((1, tq, D), lambda b, qi: (b, qi, 0)),
            scratch_shapes=[pltpu.VMEM((tq, D), jnp.float32)],   # context buffer
        )
        return pl.pallas_call(
            kernel,
            out_shape=jax.ShapeDtypeStruct((B, Sq, D), out_dtype),
            grid_spec=grid_spec,
            compiler_params=pltpu.CompilerParams(
                dimension_semantics=("parallel", "parallel"),
                vmem_limit_bytes=_vmem_limit(est),
            ),
            cost_estimate=pl.CostEstimate(flops=int(flops),
                                          transcendentals=int(transcend),
                                          bytes_accessed=int(bytes_accessed)),
        )(q_p, k_p, v_p, wo_bf, bo2)

    try:
        return run(True)
    except Exception:
        # Fallback for JAX builds that reject single-buffered (Buffered(1)) specs.
        return run(False)


# --------------------------------------------------------------------------
# Public wrapper mirroring MultiHeadSelfAttention.forward (mask=None path).
# --------------------------------------------------------------------------
def multi_head_self_attention(query, key, value, params, *, num_heads,
                              q_block=None):
    """params: dict with wq, bq, wk, bk, wv, bv, wo, bo.
    w*: [D_in, D_out] (already transposed vs. nn.Linear), b*: [D]."""
    B, Sq, D = query.shape
    _, Sk, _ = key.shape
    assert D % num_heads == 0, "d_model must be divisible by num_heads"
    head_dim = D // num_heads
    scale = 1.0 / math.sqrt(head_dim)

    # Fold the 1/sqrt(head_dim) score scale into the Q projection (exact).
    wq = params["wq"] * scale
    bq = params["bq"] * scale

    # Projections hoisted out of the attention kernel; projected activations
    # are stored in bf16 since they are only consumed as bf16 MXU operands.
    q_p = _linear(query, wq, bq, out_dtype=jnp.bfloat16)
    k_p = _linear(key, params["wk"], params["bk"], out_dtype=jnp.bfloat16)
    v_p = _linear(value, params["wv"], params["bv"], out_dtype=jnp.bfloat16)

    return _attention(q_p, k_p, v_p, params["wo"], params["bo"],
                      num_heads=num_heads, out_dtype=query.dtype,
                      q_block=q_block)


# --------------------------------------------------------------------------
# Reference + tests
# --------------------------------------------------------------------------
def _init_params(key, d_model):
    """Deterministic init mimicking nn.Linear (uniform +/- 1/sqrt(fan_in))."""
    bound = 1.0 / math.sqrt(d_model)
    keys = jax.random.split(key, 8)
    names = ["wq", "bq", "wk", "bk", "wv", "bv", "wo", "bo"]
    params = {}
    for i, name in enumerate(names):
        shape = (d_model, d_model) if name.startswith("w") else (d_model,)
        params[name] = jax.random.uniform(
            keys[i], shape, dtype=jnp.float32, minval=-bound, maxval=bound)
    return params


def _reference(query, key, value, params, *, num_heads):
    """Pure-JAX fp32 reference mirroring the PyTorch forward."""
    B, Sq, D = query.shape
    _, Sk, _ = key.shape
    hd = D // num_heads
    q = (query @ params["wq"] + params["bq"]).reshape(B, Sq, num_heads, hd).transpose(0, 2, 1, 3)
    k = (key   @ params["wk"] + params["bk"]).reshape(B, Sk, num_heads, hd).transpose(0, 2, 1, 3)
    v = (value @ params["wv"] + params["bv"]).reshape(B, Sk, num_heads, hd).transpose(0, 2, 1, 3)
    scores = jnp.einsum("bhqd,bhkd->bhqk", q, k) / math.sqrt(hd)
    attn = jax.nn.softmax(scores, axis=-1)
    ctx = jnp.einsum("bhqk,bhkd->bhqd", attn, v).transpose(0, 2, 1, 3).reshape(B, Sq, D)
    return ctx @ params["wo"] + params["bo"]


if __name__ == "__main__":
    root = jax.random.PRNGKey(0)
    k_x, k_p, k_x2 = jax.random.split(root, 3)

    # Test 1: small self-attention, single query tile.
    B, S, D, H = 2, 8, 32, 4
    x = jax.random.normal(k_x, (B, S, D), dtype=jnp.float32)
    params = _init_params(k_p, D)
    out = multi_head_self_attention(x, x, x, params, num_heads=H)
    out = jax.block_until_ready(out)
    ref = _reference(x, x, x, params, num_heads=H)
    assert out.shape == (B, S, D)
    # bf16 matmul operands + approx reciprocal -> looser tolerance than fp32.
    assert jnp.allclose(out, ref, rtol=3e-2, atol=3e-2), \
        "mismatch vs. reference (test 1)"

    # Test 2: longer sequence with an explicit q-tile to exercise the (B, nq)
    # grid of the attention kernel.
    S2 = 16
    x2 = jax.random.normal(k_x2, (B, S2, D), dtype=jnp.float32)
    out2 = multi_head_self_attention(x2, x2, x2, params, num_heads=H, q_block=8)
    out2 = jax.block_until_ready(out2)
    ref2 = _reference(x2, x2, x2, params, num_heads=H)
    assert out2.shape == (B, S2, D)
    assert jnp.allclose(out2, ref2, rtol=3e-2, atol=3e-2), \
        "mismatch vs. reference (test 2)"

    print("KERNEL_OK")
</pallas_src>

<mosaic_0001>
module attributes {stable_mosaic.version = 11 : i64} {
  func.func @_linear_kernel(%arg0: i32, %arg1: i32, %arg2: memref<1x8x32xf32, #tpu.memory_space<vmem>>, %arg3: memref<32x32xbf16, #tpu.memory_space<vmem>>, %arg4: memref<1x32xf32, #tpu.memory_space<vmem>>, %arg5: memref<1x8x32xbf16, #tpu.memory_space<vmem>>) attributes {dimension_semantics = [#tpu.dimension_semantics<parallel>, #tpu.dimension_semantics<parallel>], iteration_bounds = array<i64: 2, 1>, scalar_prefetch = 0 : i64, scratch_operands = 0 : i64, tpu.core_type = #tpu.core_type<tc>, window_params = [{transform_indices = @transform_0, window_bounds = array<i64: 1, 8, 32>}, {pipeline_mode = #tpu.pipeline_mode<synchronous>, transform_indices = @transform_1, window_bounds = array<i64: 32, 32>}, {pipeline_mode = #tpu.pipeline_mode<synchronous>, transform_indices = @transform_2, window_bounds = array<i64: 1, 32>}, {transform_indices = @transform_3, window_bounds = array<i64: 1, 8, 32>}]} {
    %c0 = arith.constant 0 : index
    %c0_0 = arith.constant 0 : index
    %c0_1 = arith.constant 0 : index
    %0 = vector.load %arg2[%c0, %c0_0, %c0_1] : memref<1x8x32xf32, #tpu.memory_space<vmem>>, vector<1x8x32xf32>
    %1 = vector.shape_cast %0 : vector<1x8x32xf32> to vector<8x32xf32>
    %2 = arith.truncf %1 : vector<8x32xf32> to vector<8x32xbf16>
    %c0_2 = arith.constant 0 : index
    %c0_3 = arith.constant 0 : index
    %3 = vector.load %arg3[%c0_2, %c0_3] : memref<32x32xbf16, #tpu.memory_space<vmem>>, vector<32x32xbf16>
    %cst = arith.constant dense<0.000000e+00> : vector<8x32xf32>
    %4 = tpu.matmul %2, %3, %cst {dimension_numbers = #tpu.dot_dimension_numbers<[1], [0], [0], [1], [0, 0, 1, 1], [], []>} : vector<8x32xbf16>, vector<32x32xbf16>, vector<8x32xf32> -> vector<8x32xf32>
    %c0_4 = arith.constant 0 : index
    %c0_5 = arith.constant 0 : index
    %5 = vector.load %arg4[%c0_4, %c0_5] : memref<1x32xf32, #tpu.memory_space<vmem>>, vector<1x32xf32>
    %6 = vector.broadcast %5 : vector<1x32xf32> to vector<8x32xf32>
    %7 = arith.addf %4, %6 : vector<8x32xf32>
    %8 = arith.truncf %7 : vector<8x32xf32> to vector<8x32xbf16>
    %c0_6 = arith.constant 0 : index
    %c0_7 = arith.constant 0 : index
    %c0_8 = arith.constant 0 : index
    %9 = vector.load %arg5[%c0_6, %c0_7, %c0_8] : memref<1x8x32xbf16, #tpu.memory_space<vmem>>, vector<1x8x32xbf16>
    %10 = vector.shape_cast %9 : vector<1x8x32xbf16> to vector<8x32xbf16>
    %11 = vector.shape_cast %8 : vector<8x32xbf16> to vector<1x8x32xbf16>
    tpu.vector_store %arg5[%c0_6, %c0_7, %c0_8], %11 {strides = array<i32>} : memref<1x8x32xbf16, #tpu.memory_space<vmem>>, vector<1x8x32xbf16>,
    return
  }
  func.func @transform_0(%arg0: i32, %arg1: i32) -> (i32, i32, i32) {
    %c0_i32 = arith.constant 0 : i32
    %c0_i32_0 = arith.constant 0 : i32
    return %arg0, %arg1, %c0_i32 : i32, i32, i32
  }
  func.func @transform_1(%arg0: i32, %arg1: i32) -> (i32, i32) {
    %c0_i32 = arith.constant 0 : i32
    %c0_i32_0 = arith.constant 0 : i32
    %c0_i32_1 = arith.constant 0 : i32
    return %c0_i32, %c0_i32_0 : i32, i32
  }
  func.func @transform_2(%arg0: i32, %arg1: i32) -> (i32, i32) {
    %c0_i32 = arith.constant 0 : i32
    %c0_i32_0 = arith.constant 0 : i32
    %c0_i32_1 = arith.constant 0 : i32
    return %c0_i32, %c0_i32_0 : i32, i32
  }
  func.func @transform_3(%arg0: i32, %arg1: i32) -> (i32, i32, i32) {
    %c0_i32 = arith.constant 0 : i32
    %c0_i32_0 = arith.constant 0 : i32
    return %arg0, %arg1, %c0_i32 : i32, i32, i32
  }
}

module attributes {stable_mosaic.version = 11 : i64} {
  func.func @_linear_kernel(%arg0: i32, %arg1: i32, %arg2: memref<1x8x32xf32, #tpu.memory_space<vmem>>, %arg3: memref<32x32xbf16, #tpu.memory_space<vmem>>, %arg4: memref<1x32xf32, #tpu.memory_space<vmem>>, %arg5: memref<1x8x32xbf16, #tpu.memory_space<vmem>>) attributes {dimension_semantics = [#tpu.dimension_semantics<parallel>, #tpu.dimension_semantics<parallel>], iteration_bounds = array<i64: 2, 1>, scalar_prefetch = 0 : i64, scratch_operands = 0 : i64, tpu.core_type = #tpu.core_type<tc>, window_params = [{transform_indices = @transform_0, window_bounds = array<i64: 1, 8, 32>}, {pipeline_mode = #tpu.pipeline_mode<synchronous>, transform_indices = @transform_1, window_bounds = array<i64: 32, 32>}, {pipeline_mode = #tpu.pipeline_mode<synchronous>, transform_indices = @transform_2, window_bounds = array<i64: 1, 32>}, {transform_indices = @transform_3, window_bounds = array<i64: 1, 8, 32>}]} {
    %c0 = arith.constant 0 : index
    %c0_0 = arith.constant 0 : index
    %c0_1 = arith.constant 0 : index
    %0 = vector.load %arg2[%c0, %c0_0, %c0_1] : memref<1x8x32xf32, #tpu.memory_space<vmem>>, vector<1x8x32xf32>
    %1 = vector.shape_cast %0 : vector<1x8x32xf32> to vector<8x32xf32>
    %2 = arith.truncf %1 : vector<8x32xf32> to vector<8x32xbf16>
    %c0_2 = arith.constant 0 : index
    %c0_3 = arith.constant 0 : index
    %3 = vector.load %arg3[%c0_2, %c0_3] : memref<32x32xbf16, #tpu.memory_space<vmem>>, vector<32x32xbf16>
    %cst = arith.constant dense<0.000000e+00> : vector<8x32xf32>
    %4 = tpu.matmul %2, %3, %cst {dimension_numbers = #tpu.dot_dimension_numbers<[1], [0], [0], [1], [0, 0, 1, 1], [], []>} : vector<8x32xbf16>, vector<32x32xbf16>, vector<8x32xf32> -> vector<8x32xf32>
    %c0_4 = arith.constant 0 : index
    %c0_5 = arith.constant 0 : index
    %5 = vector.load %arg4[%c0_4, %c0_5] : memref<1x32xf32, #tpu.memory_space<vmem>>, vector<1x32xf32>
    %6 = vector.broadcast %5 : vector<1x32xf32> to vector<8x32xf32>
    %7 = arith.addf %4, %6 : vector<8x32xf32>
    %8 = arith.truncf %7 : vector<8x32xf32> to vector<8x32xbf16>
    %c0_6 = arith.constant 0 : index
    %c0_7 = arith.constant 0 : index
    %c0_8 = arith.constant 0 : index
    %9 = vector.load %arg5[%c0_6, %c0_7, %c0_8] : memref<1x8x32xbf16, #tpu.memory_space<vmem>>, vector<1x8x32xbf16>
    %10 = vector.shape_cast %9 : vector<1x8x32xbf16> to vector<8x32xbf16>
    %11 = vector.shape_cast %8 : vector<8x32xbf16> to vector<1x8x32xbf16>
    tpu.vector_store %arg5[%c0_6, %c0_7, %c0_8], %11 {strides = array<i32>} : memref<1x8x32xbf16, #tpu.memory_space<vmem>>, vector<1x8x32xbf16>,
    return
  }
  func.func @transform_0(%arg0: i32, %arg1: i32) -> (i32, i32, i32) {
    %c0_i32 = arith.constant 0 : i32
    %c0_i32_0 = arith.constant 0 : i32
    return %arg0, %arg1, %c0_i32 : i32, i32, i32
  }
  func.func @transform_1(%arg0: i32, %arg1: i32) -> (i32, i32) {
    %c0_i32 = arith.constant 0 : i32
    %c0_i32_0 = arith.constant 0 : i32
    %c0_i32_1 = arith.constant 0 : i32
    return %c0_i32, %c0_i32_0 : i32, i32
  }
  func.func @transform_2(%arg0: i32, %arg1: i32) -> (i32, i32) {
    %c0_i32 = arith.constant 0 : i32
    %c0_i32_0 = arith.constant 0 : i32
    %c0_i32_1 = arith.constant 0 : i32
    return %c0_i32, %c0_i32_0 : i32, i32
  }
  func.func @transform_3(%arg0: i32, %arg1: i32) -> (i32, i32, i32) {
    %c0_i32 = arith.constant 0 : i32
    %c0_i32_0 = arith.constant 0 : i32
    return %arg0, %arg1, %c0_i32 : i32, i32, i32
  }
}

</mosaic_0001>

<bundles_post_ra>
// kernel: tpu_custom_call.1
= control target key start
LH: loop header
LB: loop body
LE: loop exit
PB: predicated region body
PF: predicated region fallthrough
CT: control target
= control target key end

     0   :  { %8 = vsyncpa [#allocation3], 0  ;;  %s896_s0 = inlined_call_operand.hbm [shape: f32[2,8,32], index: 0, kind: input, shape index: {}]   ;;  %s897_s1 = inlined_call_operand.hbm [shape: bf16[32,32], index: 1, kind: input, shape index: {}]   ;;  %s898_s2 = inlined_call_operand.vmem [shape: f32[1,32], index: 2, kind: input, shape index: {}]   ;;  %s899_s3 = inlined_call_operand.hbm [shape: bf16[2,8,32], index: 3, kind: output, shape index: {}]  }
   0x1   :  { %10 = vsyncpa [#allocation3 + $0x1], 0 }
   0x2   :  { %11 = vsyncpa [#allocation6], 0 }
   0x3   :  { %12 = vsyncpa [#allocation4], 0 }
   0x4   :  { %14 = vsyncpa [#allocation4 + $0x1], 0  ;;  %s678_s12 = smov 0   ;;  %s680_s13 = smov 0  }
   0x5   :  { %s682_s14 = smov 0   ;;  %s684_s15 = smov 0  }
   0x6   :  { %s686_s16 = smov 0   ;;  %s688_s17 = smov 0  }
   0x7 LB: > { %s396_s18 = sadd.s32 4294967295, %s649_s17   ;;  %s397_s19 = sadd.s32 4294967294, %s649_s17   ;;  %s649_s17 = sphi %s688_s17, %s20_s17   ;;  %s645_s16 = sphi %s686_s16, %s923_s16   ;;  %s641_s15 = sphi %s684_s15, %s922_s15   ;;  %s637_s14 = sphi %s682_s14, %s921_s14   ;;  %s633_s13 = sphi %s680_s13, %s920_s13   ;;  %s629_s12 = sphi %s678_s12, %s919_s12  }
   0x8   : > { %p54_p0 = scmp.ne.s32.totalorder %s633_s13, %s629_s12  ;;  %p712_p1 = scmp.eq.s32.totalorder %s396_s18, 0 }
   0x9   : > { %p716_p2 = scmp.eq.s32.totalorder %s396_s18, 1  ;;  %p128_p3 = scmp.eq.s32.totalorder %s397_s19, 1 }
   0xa   : > { %s904_s20 = scalar_select %p712_p1, 1, 0 }
   0xb   : > { %s905_s21 = scalar_select %p716_p2, 1, 0 }
   0xc   : > { %p722_p4 = por %p712_p1, %p54_p0  ;;  %p398_p5 = scmp.ge.s32.totalorder %s649_s17, 1 }
   0xd   : > { %p727_p6 = por %p128_p3, %p54_p0  ;;  %p135_p7 = scmp.lt.s32.totalorder %s649_s17, 3 }
   0xe   : > { %s906_s22 = scalar_select %p722_p4, 1, 0 }
   0xf   : > { %s907_s23 = scalar_select %p727_p6, 1, 0 }
  0x10   : > { %p732_p8 = pnand %p398_p5, %p135_p7  ;;  %s651_s25 = smov [#allocation5]  }
  0x11   : > { %s147_s26 = sshll.u32 %s651_s25, 4  ;;  %s32_s28 = sadd.s32 1, %s645_s16  ;;  %s148_s26 = int_to_ptr.vmem [resolvable:$true] %s147_s26 }
  0x12   : > { %s908_s24 = scalar_select %p732_p8, 1, 0 }
  0x13   : > { %p434_p9 = pneg %p732_p8  ;;  %s505_s4 = scalar_lea.hbm %s897_s1, 256 }
  0x14   : > { %p506_p12 = scmp.ne.s32.totalorder %s897_s1, %s505_s4  ;;  %p512_p5 = scmp.lt.u32.totalorder %s505_s4, %s897_s1 }
  0x15   : > { %p741_p11 = pnand %p434_p9, %p712_p1 }
  0x17   : > { %p507_p13 = pneg %p741_p11 }
  0x19   : > { %p508_p0 = pnand %p507_p13, %p506_p12 }
  0x1b   : > { %p509_p3 = pneg %p508_p0 }
  0x1d   : > { %p514_p7 = pnand %p512_p5, %p509_p3 }
  0x1f   : > { %517 = shalt.err (!%p514_p7)
}
  0x20   : > { %s518_s9 = scalar_lea.vmem %s148_s26, 256  ;;  %p526_p1 = scmp.lt.s32.totalorder %s148_s26, %s148_s26 }
  0x21   : > { %p519_p9 = scmp.ne.s32.totalorder %s148_s26, %s518_s9  ;;  %p527_p4 = scmp.lt.s32.totalorder %s518_s9, %s518_s9 }
  0x23   : > { %p521_p10 = pnand %p519_p9, %p507_p13  ;;  %p528_p8 = por %p527_p4, %p526_p1 }
  0x25   : > { %p522_p6 = pneg %p521_p10 }
  0x27   : > { %p529_p2 = pnand %p528_p8, %p522_p6 }
  0x29   : > { %532 = shalt.err (!%p529_p2)
}
  0x2a   : > { %s652_s10 = smov 64   ;;  %s653_s11 = smov 4  }
  0x2b   : > { %437 = dma.hbm_to_vmem [thread:$0]  (!%p741_p11), %s897_s1, 256, %s148_s26, [#allocation6], %s652_s10, %s652_s10, %s653_s11  }
  0x2c   : > { %p34_p1 = scmp.ge.s32.totalorder %s32_s28, 2  ;;  %s41_s25 = sadd.s32 1, %s637_s14 }
  0x2d   : > { %p48_p2 = scmp.ne.s32.totalorder %s637_s14, %s633_s13  ;;  %p49_p4 = scmp.eq.s32.totalorder %s649_s17, 0 }
  0x2e   : > { %s925_s28 = smov (%p34_p1, %s32_s28), 0  ;;  %p911_p8 = scmp.ne.s32.totalorder %s905_s21, 0 }
  0x2f   : > { %p768_p6 = por %p49_p4, %p48_p2  ;;  %s36_s27 = ssub.s32 %s645_s16, %s925_s28 }
  0x30   : > { %p774_p10 = por %p911_p8, %p48_p2  ;;  %p447_p12 = scmp.lt.s32.totalorder %s649_s17, 2 }
  0x31   : > { %p39_p11 = scmp.eq.s32.totalorder %s36_s27, 0  ;;  %s164_s26 = sand.u32 1, %s637_s14  }
  0x32   : > { %s401_s4 = sshll.u32 %s164_s26, 3  ;;  %s402_s6 = sshll.u32 %s645_s16, 7 }
  0x33   : > { %s783_s5 = scalar_select %p39_p11, %s637_s14, %s41_s25  }
  0x34   : > { %s789_s9 = scalar_lea.hbm %s896_s0, %s402_s6  ;;  %s168_s21 = scalar_lea.vmem [#allocation2], %s401_s4 }
  0x35   : > { %s176_s10 = sshll.u32 %s168_s21, 4  ;;  %p795_p13 = pnand %p447_p12, %p768_p6  ;;  %s791_s10 = int_to_ptr.vmem [resolvable:$true] %s176_s10 }
  0x36   : > { %s165_s18 = scalar_lea.sflag [#allocation3], %s164_s26  ;;  %s533_s19 = scalar_lea.hbm %s789_s9, 128 }
  0x37   : > { %p534_p0 = scmp.ne.s32.totalorder %s789_s9, %s533_s19  ;;  %p535_p3 = pneg %p795_p13 }
  0x38   : > { %s538_s4 = scalar_lea.hbm %s896_s0, 256  ;;  %p539_p9 = scmp.lt.u32.totalorder %s789_s9, %s896_s0 }
  0x39   : > { %p536_p5 = pnand %p535_p3, %p534_p0  ;;  %p540_p1 = scmp.lt.u32.totalorder %s538_s4, %s533_s19 }
  0x3a   : > { %p542_p4 = scmp.lt.u32.totalorder %s533_s19, %s789_s9 }
  0x3b   : > { %p537_p7 = pneg %p536_p5  ;;  %p541_p2 = por %p540_p1, %p539_p9 }
  0x3d   : > { %p543_p6 = por %p542_p4, %p541_p2 }
  0x3f   : > { %p544_p8 = pnand %p543_p6, %p537_p7 }
  0x41   : > { %547 = shalt.err (!%p544_p8)
}
  0x42   : > { %s548_s26 = scalar_lea.vmem %s791_s10, 128  ;;  %s654_s7 = smov [#allocation2]  }
  0x43   : > { %p549_p12 = scmp.ne.s32.totalorder %s791_s10, %s548_s26  ;;  %s553_s8 = sshll.u32 %s654_s7, 4  ;;  %s554_s8 = int_to_ptr.vmem [resolvable:$false] %s553_s8 }
  0x44   : > { %s555_s21 = scalar_lea.vmem %s554_s8, 256  ;;  %p556_p5 = scmp.lt.s32.totalorder %s791_s10, %s554_s8 }
  0x45   : > { %p551_p11 = pnand %p549_p12, %p535_p3  ;;  %p557_p9 = scmp.lt.s32.totalorder %s555_s21, %s548_s26 }
  0x47   : > { %p552_p0 = pneg %p551_p11  ;;  %p558_p1 = por %p557_p9, %p556_p5 }
  0x49   : > { %p559_p2 = pnand %p558_p1, %p552_p0 }
  0x4b   : > { %562 = shalt.err (!%p559_p2)
}
  0x4c   : > { %441 = dma.hbm_to_vmem [thread:$0]  (!%p795_p13), %s789_s9, 128, %s791_s10, %s165_s18  }
  0x4d   : > { %p914_p7 = scmp.ne.s32.totalorder %s908_s24, 0 }
  0x4e   : > { %s827_s19 = sand.u32 (!%p914_p7), 1, %s633_s13   ;;  %p915_p3 = scmp.ne.s32.totalorder (!%p914_p7), %s906_s22, 0 }
  0x4f   : > { %185 = sbr.rel (%p914_p7) target bundleno = 329 (0x149), region = 32  ;;  %s404_s25 = sshll.u32 (!%p914_p7), %s827_s19, 3 }
  0x50   : > { %s188_s27 = scalar_lea.sflag (!%p914_p7), [#allocation3], %s827_s19  ;;  %s191_s4 = scalar_lea.vmem (!%p914_p7), [#allocation2], %s404_s25 }
  0x56   : > { %616 = dma.done.wait (%p915_p3), %s188_s27, 128  }
  0x57   : > { %618 = vsyncadd (%p915_p3), %s188_s27, 4294967168  ;;  %p916_p4 = scmp.ne.s32.totalorder %s904_s20, 0 }
  0x59   : > { %620 = dma.done.wait (%p916_p4), [#allocation6], 256  }
  0x5a   : > { %622 = vsyncadd (%p916_p4), [#allocation6], 4294967040  ;;  %v655_v0 = vmov 0.0   ;;  %vm656_vm0 = vmmov 0   ;;  %v503_v1 = vld [vmem:[#allocation5] sm:$0xff]   ;;  %v504_v2 = vld [vmem:[#allocation5 + $0x8] sm:$0xff]  }
  0x5b   : > { %418 = vmatprep.subr.bf16.mxu0 %v655_v0  ;;  %422 = vmatprep.mubr.msk.bf16.mxu0 %vm656_vm0, %v655_v0  ;;  %v219_v3 = vld [vmem:[%s191_s4] sm:$0xff]  ;;  %vm244_vm1 = vcmask 261120   ;;  %s406_s22 = sshll.u32 %s827_s19, 2  ;;  %s412_s9 = sshll.u32 %s641_s15, 6  ;;  %vm289_vm2 = vcmask 257024  }
  0x5c   : > { %419 = vmatpush3.bf16.msra.mxu0 %v503_v1  ;;  %v220_v4 = vpack.c.bf16 %v219_v3, %v219_v3  ;;  %v407_v5 = vld [vmem:[%s898_s2] ss:$0 sm:$0xff]  ;;  %s217_s10 = scalar_lea.vmem [#allocation7], %s406_s22  ;;  %s847_s6 = scalar_lea.hbm %s899_s3, %s412_s9 }
  0x5d   : > { %420 = vmatprep.subr.bf16.mxu0 %v655_v0  ;;  %s306_s11 = sshll.u32 %s217_s10, 4  ;;  %s292_s15 = scalar_lea.sflag [#allocation4], %s827_s19  ;;  %s849_s11 = int_to_ptr.vmem [resolvable:$true] %s306_s11 }
  0x5e   : > { %s563_s26 = scalar_lea.vmem %s849_s11, 64  ;;  %s657_s7 = smov [#allocation7]  }
  0x5f   : > { %p564_p13 = scmp.ne.s32.totalorder %s849_s11, %s563_s26  ;;  %s567_s8 = sshll.u32 %s657_s7, 4  ;;  %s568_s8 = int_to_ptr.vmem [resolvable:$false] %s567_s8 }
  0x60   : > { %421 = vmatpush3.bf16.msra.mxu0 %v504_v2  ;;  %s569_s21 = scalar_lea.vmem %s568_s8, 128  ;;  %p570_p12 = scmp.lt.s32.totalorder %s849_s11, %s568_s8 }
  0x61   : > { %p565_p6 = pnand %p564_p13, %p774_p10  ;;  %p571_p11 = scmp.lt.s32.totalorder %s569_s21, %s563_s26 }
  0x63   : > { %423 = vmatmul.mubr.msk.bf16.vlgmr.msra.gmra.mrb[0].mxu0 %vm244_vm1, %v220_v4  ;;  %p566_p8 = pneg %p565_p6  ;;  %p572_p0 = por %p571_p11, %p570_p12 }
  0x65   : > { %p573_p5 = pnand %p572_p0, %p566_p8 }
 0x136   : > { %v282_v6 = vpop.f32.mrb[0].mxu0 }
 0x137   : > { %v283_v7 = vadd.f32 %v407_v5, %v282_v6  ;;  %v424_v8 = vpop.f32.mrb[1].mxu0 }
 0x138   : > { %v285_v9 = vpop.f32.mrb[2].mxu0 }
 0x139   : > { %v288_v10 = vpack.c.bf16 %v283_v7, %v283_v7  ;;  %v425_v11 = vpop.f32.mrb[3].mxu0 }
 0x13b   : > { %290 = vst.msk [vmem:[%s217_s10] sm:$0xf] %vm289_vm2, %v288_v10 }
 0x13c   : > { %576 = shalt.err (!%p573_p5)
}
 0x13d   : > { %s577_s19 = scalar_lea.hbm %s847_s6, 64  ;;  %s581_s4 = scalar_lea.hbm %s899_s3, 128 }
 0x13e   : > { %p578_p9 = scmp.ne.s32.totalorder %s847_s6, %s577_s19  ;;  %p582_p7 = scmp.lt.u32.totalorder %s847_s6, %s899_s3 }
 0x13f   : > { %p583_p3 = scmp.lt.u32.totalorder %s581_s4, %s577_s19  ;;  %p585_p13 = scmp.lt.u32.totalorder %s577_s19, %s847_s6 }
 0x140   : > { %p579_p1 = pnand %p578_p9, %p774_p10 }
 0x141   : > { %p584_p4 = por %p583_p3, %p582_p7 }
 0x142   : > { %p580_p2 = pneg %p579_p1 }
 0x143   : > { %p586_p6 = por %p585_p13, %p584_p4 }
 0x145   : > { %p587_p8 = pnand %p586_p6, %p580_p2 }
 0x147   : > { %590 = shalt.err (!%p587_p8)
}
 0x148   : > { %432 = dma.vmem_to_hbm [thread:$0]  (%p774_p10), %s849_s11, 64, %s847_s6, %s292_s15  }
 0x149 PF: > { %s318_s20 = sand.u32 1, %s629_s12   ;;  %p917_p12 = scmp.ne.s32.totalorder %s907_s23, 0 }
 0x14a   : > { %p918_p11 = scmp.ge.s32.totalorder %s649_s17, 2  ;;  %s319_s9 = scalar_lea.sflag [#allocation4], %s318_s20 }
 0x14c   : > { %p443_p0 = pnand %p918_p11, %p917_p12 }
 0x14e   : > { %624 = dma.done.wait (!%p443_p0), %s319_s9, 64  }
 0x14f   : > { %626 = vsyncadd (!%p443_p0), %s319_s9, 4294967232  ;;  %s20_s17 = sadd.s32 1, %s649_s17   ;;  %s919_s12 = smov %s633_s13 }
 0x150   : > { %p17_p5 = scmp.ge.s32.totalorder %s20_s17, 4   ;;  %s920_s13 = smov %s637_s14 }
 0x151   : > { %s921_s14 = smov %s783_s5  ;;  %s922_s15 = smov %s645_s16 }
 0x152   : > { %s923_s16 = smov %s925_s28  ;;  %19 = sbr.rel (!%p17_p5) target bundleno = 7 (0x7), region = 81 }
 0x159   :  { %324 = vsyncpa [#allocation3], 1 }
 0x15a   :  { %326 = vsyncpa [#allocation3 + $0x1], 1 }
 0x15b   :  { %327 = vsyncpa [#allocation6], 1 }
 0x15c   :  { %328 = vsyncpa [#allocation4], 1 }
 0x15d   :  { %330 = vsyncpa [#allocation4 + $0x1], 1 }

// kernel: tpu_custom_call.1
= control target key start
LH: loop header
LB: loop body
LE: loop exit
PB: predicated region body
PF: predicated region fallthrough
CT: control target
= control target key end

     0   :  { %8 = vsyncpa [#allocation3], 0  ;;  %s896_s0 = inlined_call_operand.hbm [shape: f32[2,8,32], index: 0, kind: input, shape index: {}]   ;;  %s897_s1 = inlined_call_operand.hbm [shape: bf16[32,32], index: 1, kind: input, shape index: {}]   ;;  %s898_s2 = inlined_call_operand.vmem [shape: f32[1,32], index: 2, kind: input, shape index: {}]   ;;  %s899_s3 = inlined_call_operand.hbm [shape: bf16[2,8,32], index: 3, kind: output, shape index: {}]  }
   0x1   :  { %10 = vsyncpa [#allocation3 + $0x1], 0 }
   0x2   :  { %11 = vsyncpa [#allocation6], 0 }
   0x3   :  { %12 = vsyncpa [#allocation4], 0 }
   0x4   :  { %14 = vsyncpa [#allocation4 + $0x1], 0  ;;  %s678_s12 = smov 0   ;;  %s680_s13 = smov 0  }
   0x5   :  { %s682_s14 = smov 0   ;;  %s684_s15 = smov 0  }
   0x6   :  { %s686_s16 = smov 0   ;;  %s688_s17 = smov 0  }
   0x7 LB: > { %s396_s18 = sadd.s32 4294967295, %s649_s17   ;;  %s397_s19 = sadd.s32 4294967294, %s649_s17   ;;  %s649_s17 = sphi %s688_s17, %s20_s17   ;;  %s645_s16 = sphi %s686_s16, %s923_s16   ;;  %s641_s15 = sphi %s684_s15, %s922_s15   ;;  %s637_s14 = sphi %s682_s14, %s921_s14   ;;  %s633_s13 = sphi %s680_s13, %s920_s13   ;;  %s629_s12 = sphi %s678_s12, %s919_s12  }
   0x8   : > { %p54_p0 = scmp.ne.s32.totalorder %s633_s13, %s629_s12  ;;  %p712_p1 = scmp.eq.s32.totalorder %s396_s18, 0 }
   0x9   : > { %p716_p2 = scmp.eq.s32.totalorder %s396_s18, 1  ;;  %p128_p3 = scmp.eq.s32.totalorder %s397_s19, 1 }
   0xa   : > { %s904_s20 = scalar_select %p712_p1, 1, 0 }
   0xb   : > { %s905_s21 = scalar_select %p716_p2, 1, 0 }
   0xc   : > { %p722_p4 = por %p712_p1, %p54_p0  ;;  %p398_p5 = scmp.ge.s32.totalorder %s649_s17, 1 }
   0xd   : > { %p727_p6 = por %p128_p3, %p54_p0  ;;  %p135_p7 = scmp.lt.s32.totalorder %s649_s17, 3 }
   0xe   : > { %s906_s22 = scalar_select %p722_p4, 1, 0 }
   0xf   : > { %s907_s23 = scalar_select %p727_p6, 1, 0 }
  0x10   : > { %p732_p8 = pnand %p398_p5, %p135_p7  ;;  %s651_s25 = smov [#allocation5]  }
  0x11   : > { %s147_s26 = sshll.u32 %s651_s25, 4  ;;  %s32_s28 = sadd.s32 1, %s645_s16  ;;  %s148_s26 = int_to_ptr.vmem [resolvable:$true] %s147_s26 }
  0x12   : > { %s908_s24 = scalar_select %p732_p8, 1, 0 }
  0x13   : > { %p434_p9 = pneg %p732_p8  ;;  %s505_s4 = scalar_lea.hbm %s897_s1, 256 }
  0x14   : > { %p506_p12 = scmp.ne.s32.totalorder %s897_s1, %s505_s4  ;;  %p512_p5 = scmp.lt.u32.totalorder %s505_s4, %s897_s1 }
  0x15   : > { %p741_p11 = pnand %p434_p9, %p712_p1 }
  0x17   : > { %p507_p13 = pneg %p741_p11 }
  0x19   : > { %p508_p0 = pnand %p507_p13, %p506_p12 }
  0x1b   : > { %p509_p3 = pneg %p508_p0 }
  0x1d   : > { %p514_p7 = pnand %p512_p5, %p509_p3 }
  0x1f   : > { %517 = shalt.err (!%p514_p7)
}
  0x20   : > { %s518_s9 = scalar_lea.vmem %s148_s26, 256  ;;  %p526_p1 = scmp.lt.s32.totalorder %s148_s26, %s148_s26 }
  0x21   : > { %p519_p9 = scmp.ne.s32.totalorder %s148_s26, %s518_s9  ;;  %p527_p4 = scmp.lt.s32.totalorder %s518_s9, %s518_s9 }
  0x23   : > { %p521_p10 = pnand %p519_p9, %p507_p13  ;;  %p528_p8 = por %p527_p4, %p526_p1 }
  0x25   : > { %p522_p6 = pneg %p521_p10 }
  0x27   : > { %p529_p2 = pnand %p528_p8, %p522_p6 }
  0x29   : > { %532 = shalt.err (!%p529_p2)
}
  0x2a   : > { %s652_s10 = smov 64   ;;  %s653_s11 = smov 4  }
  0x2b   : > { %437 = dma.hbm_to_vmem [thread:$0]  (!%p741_p11), %s897_s1, 256, %s148_s26, [#allocation6], %s652_s10, %s652_s10, %s653_s11  }
  0x2c   : > { %p34_p1 = scmp.ge.s32.totalorder %s32_s28, 2  ;;  %s41_s25 = sadd.s32 1, %s637_s14 }
  0x2d   : > { %p48_p2 = scmp.ne.s32.totalorder %s637_s14, %s633_s13  ;;  %p49_p4 = scmp.eq.s32.totalorder %s649_s17, 0 }
  0x2e   : > { %s925_s28 = smov (%p34_p1, %s32_s28), 0  ;;  %p911_p8 = scmp.ne.s32.totalorder %s905_s21, 0 }
  0x2f   : > { %p768_p6 = por %p49_p4, %p48_p2  ;;  %s36_s27 = ssub.s32 %s645_s16, %s925_s28 }
  0x30   : > { %p774_p10 = por %p911_p8, %p48_p2  ;;  %p447_p12 = scmp.lt.s32.totalorder %s649_s17, 2 }
  0x31   : > { %p39_p11 = scmp.eq.s32.totalorder %s36_s27, 0  ;;  %s164_s26 = sand.u32 1, %s637_s14  }
  0x32   : > { %s401_s4 = sshll.u32 %s164_s26, 3  ;;  %s402_s6 = sshll.u32 %s645_s16, 7 }
  0x33   : > { %s783_s5 = scalar_select %p39_p11, %s637_s14, %s41_s25  }
  0x34   : > { %s789_s9 = scalar_lea.hbm %s896_s0, %s402_s6  ;;  %s168_s21 = scalar_lea.vmem [#allocation2], %s401_s4 }
  0x35   : > { %s176_s10 = sshll.u32 %s168_s21, 4  ;;  %p795_p13 = pnand %p447_p12, %p768_p6  ;;  %s791_s10 = int_to_ptr.vmem [resolvable:$true] %s176_s10 }
  0x36   : > { %s165_s18 = scalar_lea.sflag [#allocation3], %s164_s26  ;;  %s533_s19 = scalar_lea.hbm %s789_s9, 128 }
  0x37   : > { %p534_p0 = scmp.ne.s32.totalorder %s789_s9, %s533_s19  ;;  %p535_p3 = pneg %p795_p13 }
  0x38   : > { %s538_s4 = scalar_lea.hbm %s896_s0, 256  ;;  %p539_p9 = scmp.lt.u32.totalorder %s789_s9, %s896_s0 }
  0x39   : > { %p536_p5 = pnand %p535_p3, %p534_p0  ;;  %p540_p1 = scmp.lt.u32.totalorder %s538_s4, %s533_s19 }
  0x3a   : > { %p542_p4 = scmp.lt.u32.totalorder %s533_s19, %s789_s9 }
  0x3b   : > { %p537_p7 = pneg %p536_p5  ;;  %p541_p2 = por %p540_p1, %p539_p9 }
  0x3d   : > { %p543_p6 = por %p542_p4, %p541_p2 }
  0x3f   : > { %p544_p8 = pnand %p543_p6, %p537_p7 }
  0x41   : > { %547 = shalt.err (!%p544_p8)
}
  0x42   : > { %s548_s26 = scalar_lea.vmem %s791_s10, 128  ;;  %s654_s7 = smov [#allocation2]  }
  0x43   : > { %p549_p12 = scmp.ne.s32.totalorder %s791_s10, %s548_s26  ;;  %s553_s8 = sshll.u32 %s654_s7, 4  ;;  %s554_s8 = int_to_ptr.vmem [resolvable:$false] %s553_s8 }
  0x44   : > { %s555_s21 = scalar_lea.vmem %s554_s8, 256  ;;  %p556_p5 = scmp.lt.s32.totalorder %s791_s10, %s554_s8 }
  0x45   : > { %p551_p11 = pnand %p549_p12, %p535_p3  ;;  %p557_p9 = scmp.lt.s32.totalorder %s555_s21, %s548_s26 }
  0x47   : > { %p552_p0 = pneg %p551_p11  ;;  %p558_p1 = por %p557_p9, %p556_p5 }
  0x49   : > { %p559_p2 = pnand %p558_p1, %p552_p0 }
  0x4b   : > { %562 = shalt.err (!%p559_p2)
}
  0x4c   : > { %441 = dma.hbm_to_vmem [thread:$0]  (!%p795_p13), %s789_s9, 128, %s791_s10, %s165_s18  }
  0x4d   : > { %p914_p7 = scmp.ne.s32.totalorder %s908_s24, 0 }
  0x4e   : > { %s827_s19 = sand.u32 (!%p914_p7), 1, %s633_s13   ;;  %p915_p3 = scmp.ne.s32.totalorder (!%p914_p7), %s906_s22, 0 }
  0x4f   : > { %185 = sbr.rel (%p914_p7) target bundleno = 329 (0x149), region = 32  ;;  %s404_s25 = sshll.u32 (!%p914_p7), %s827_s19, 3 }
  0x50   : > { %s188_s27 = scalar_lea.sflag (!%p914_p7), [#allocation3], %s827_s19  ;;  %s191_s4 = scalar_lea.vmem (!%p914_p7), [#allocation2], %s404_s25 }
  0x56   : > { %616 = dma.done.wait (%p915_p3), %s188_s27, 128  }
  0x57   : > { %618 = vsyncadd (%p915_p3), %s188_s27, 4294967168  ;;  %p916_p4 = scmp.ne.s32.totalorder %s904_s20, 0 }
  0x59   : > { %620 = dma.done.wait (%p916_p4), [#allocation6], 256  }
  0x5a   : > { %622 = vsyncadd (%p916_p4), [#allocation6], 4294967040  ;;  %v655_v0 = vmov 0.0   ;;  %vm656_vm0 = vmmov 0   ;;  %v503_v1 = vld [vmem:[#allocation5] sm:$0xff]   ;;  %v504_v2 = vld [vmem:[#allocation5 + $0x8] sm:$0xff]  }
  0x5b   : > { %418 = vmatprep.subr.bf16.mxu0 %v655_v0  ;;  %422 = vmatprep.mubr.msk.bf16.mxu0 %vm656_vm0, %v655_v0  ;;  %v219_v3 = vld [vmem:[%s191_s4] sm:$0xff]  ;;  %vm244_vm1 = vcmask 261120   ;;  %s406_s22 = sshll.u32 %s827_s19, 2  ;;  %s412_s9 = sshll.u32 %s641_s15, 6  ;;  %vm289_vm2 = vcmask 257024  }
  0x5c   : > { %419 = vmatpush3.bf16.msra.mxu0 %v503_v1  ;;  %v220_v4 = vpack.c.bf16 %v219_v3, %v219_v3  ;;  %v407_v5 = vld [vmem:[%s898_s2] ss:$0 sm:$0xff]  ;;  %s217_s10 = scalar_lea.vmem [#allocation7], %s406_s22  ;;  %s847_s6 = scalar_lea.hbm %s899_s3, %s412_s9 }
  0x5d   : > { %420 = vmatprep.subr.bf16.mxu0 %v655_v0  ;;  %s306_s11 = sshll.u32 %s217_s10, 4  ;;  %s292_s15 = scalar_lea.sflag [#allocation4], %s827_s19  ;;  %s849_s11 = int_to_ptr.vmem [resolvable:$true] %s306_s11 }
  0x5e   : > { %s563_s26 = scalar_lea.vmem %s849_s11, 64  ;;  %s657_s7 = smov [#allocation7]  }
  0x5f   : > { %p564_p13 = scmp.ne.s32.totalorder %s849_s11, %s563_s26  ;;  %s567_s8 = sshll.u32 %s657_s7, 4  ;;  %s568_s8 = int_to_ptr.vmem [resolvable:$false] %s567_s8 }
  0x60   : > { %421 = vmatpush3.bf16.msra.mxu0 %v504_v2  ;;  %s569_s21 = scalar_lea.vmem %s568_s8, 128  ;;  %p570_p12 = scmp.lt.s32.totalorder %s849_s11, %s568_s8 }
  0x61   : > { %p565_p6 = pnand %p564_p13, %p774_p10  ;;  %p571_p11 = scmp.lt.s32.totalorder %s569_s21, %s563_s26 }
  0x63   : > { %423 = vmatmul.mubr.msk.bf16.vlgmr.msra.gmra.mrb[0].mxu0 %vm244_vm1, %v220_v4  ;;  %p566_p8 = pneg %p565_p6  ;;  %p572_p0 = por %p571_p11, %p570_p12 }
  0x65   : > { %p573_p5 = pnand %p572_p0, %p566_p8 }
 0x136   : > { %v282_v6 = vpop.f32.mrb[0].mxu0 }
 0x137   : > { %v283_v7 = vadd.f32 %v407_v5, %v282_v6  ;;  %v424_v8 = vpop.f32.mrb[1].mxu0 }
 0x138   : > { %v285_v9 = vpop.f32.mrb[2].mxu0 }
 0x139   : > { %v288_v10 = vpack.c.bf16 %v283_v7, %v283_v7  ;;  %v425_v11 = vpop.f32.mrb[3].mxu0 }
 0x13b   : > { %290 = vst.msk [vmem:[%s217_s10] sm:$0xf] %vm289_vm2, %v288_v10 }
 0x13c   : > { %576 = shalt.err (!%p573_p5)
}
 0x13d   : > { %s577_s19 = scalar_lea.hbm %s847_s6, 64  ;;  %s581_s4 = scalar_lea.hbm %s899_s3, 128 }
 0x13e   : > { %p578_p9 = scmp.ne.s32.totalorder %s847_s6, %s577_s19  ;;  %p582_p7 = scmp.lt.u32.totalorder %s847_s6, %s899_s3 }
 0x13f   : > { %p583_p3 = scmp.lt.u32.totalorder %s581_s4, %s577_s19  ;;  %p585_p13 = scmp.lt.u32.totalorder %s577_s19, %s847_s6 }
 0x140   : > { %p579_p1 = pnand %p578_p9, %p774_p10 }
 0x141   : > { %p584_p4 = por %p583_p3, %p582_p7 }
 0x142   : > { %p580_p2 = pneg %p579_p1 }
 0x143   : > { %p586_p6 = por %p585_p13, %p584_p4 }
 0x145   : > { %p587_p8 = pnand %p586_p6, %p580_p2 }
 0x147   : > { %590 = shalt.err (!%p587_p8)
}
 0x148   : > { %432 = dma.vmem_to_hbm [thread:$0]  (%p774_p10), %s849_s11, 64, %s847_s6, %s292_s15  }
 0x149 PF: > { %s318_s20 = sand.u32 1, %s629_s12   ;;  %p917_p12 = scmp.ne.s32.totalorder %s907_s23, 0 }
 0x14a   : > { %p918_p11 = scmp.ge.s32.totalorder %s649_s17, 2  ;;  %s319_s9 = scalar_lea.sflag [#allocation4], %s318_s20 }
 0x14c   : > { %p443_p0 = pnand %p918_p11, %p917_p12 }
 0x14e   : > { %624 = dma.done.wait (!%p443_p0), %s319_s9, 64  }
 0x14f   : > { %626 = vsyncadd (!%p443_p0), %s319_s9, 4294967232  ;;  %s20_s17 = sadd.s32 1, %s649_s17   ;;  %s919_s12 = smov %s633_s13 }
 0x150   : > { %p17_p5 = scmp.ge.s32.totalorder %s20_s17, 4   ;;  %s920_s13 = smov %s637_s14 }
 0x151   : > { %s921_s14 = smov %s783_s5  ;;  %s922_s15 = smov %s645_s16 }
 0x152   : > { %s923_s16 = smov %s925_s28  ;;  %19 = sbr.rel (!%p17_p5) target bundleno = 7 (0x7), region = 81 }
 0x159   :  { %324 = vsyncpa [#allocation3], 1 }
 0x15a   :  { %326 = vsyncpa [#allocation3 + $0x1], 1 }
 0x15b   :  { %327 = vsyncpa [#allocation6], 1 }
 0x15c   :  { %328 = vsyncpa [#allocation4], 1 }
 0x15d   :  { %330 = vsyncpa [#allocation4 + $0x1], 1 }

</bundles_post_ra>
